<compile_context>
chip_gen: v5e
topology: v5e:2x2
jax: 0.10.0
libtpu: 0.0.40
codegen_flags: <defaults>
</compile_context>

<pallas_src>
import jax
import jax.numpy as jnp
from jax.experimental import pallas as pl
from jax.experimental.pallas import tpu as pltpu

IN_DIM = 3
HID_DIM = 64
OUT_DIM = 28 * 28          # 784 (written at natural width; no padding)
DEFAULT_TB = 2048          # max batch tile (multiple of 8)


def _round_up(x, m):
    return ((x + m - 1) // m) * m


def _choose_tiling(batch, max_tb):
    """Pick (tile_b, padded_batch, num_steps).

    - tile_b is a multiple of 8 and <= max_tb.
    - padded_batch - batch is at most a few rows (never ~a full tile).
    - num_steps is >= 2 (and even) whenever batch >= 16 so v7x can shard the
      batch-tile grid across both TensorCores.
    """
    b8 = _round_up(max(batch, 1), 8)
    n = pl.cdiv(b8, max_tb)
    if n == 1 and b8 >= 16:
        n = 2                       # at least two independent tiles for v7x
    elif n > 1 and n % 2 == 1:
        n += 1                      # even step count -> balanced across 2 TCs
    tb = _round_up(pl.cdiv(b8, n), 8)
    return tb, n * tb, n


def _vmem_limit_bytes(tb, w2_bytes_per_elem):
    # Double-buffered streamed tiles + (double-buffered) resident params,
    # plus headroom for compiler-internal scratch; capped below v7x's 64 MiB.
    buffers = 2 * (tb * IN_DIM * 4 + tb * OUT_DIM * 4)
    buffers += 2 * (IN_DIM * HID_DIM * 4 + HID_DIM * 4
                    + HID_DIM * OUT_DIM * w2_bytes_per_elem + OUT_DIM * 4)
    return min(buffers + (16 << 20), 48 << 20)


def decoder_kernel(x_ref, w1_ref, b1_ref, w2_ref, b2_ref, o_ref):
    # x_ref: (TB, 3)   w1_ref: (3, 64)   b1_ref: (1, 64)
    # w2_ref: (64, 784)   b2_ref: (1, 784)   o_ref: (TB, 784)
    x = x_ref[...]
    w1 = w1_ref[...]

    # First layer on the VPU: K=3 is far too shallow for an MXU pass.
    # (TB,1)*(1,64) broadcasts -> (TB,64); three FMAs + bias, then ReLU.
    h = (x[:, 0:1] * w1[0:1, :]
         + x[:, 1:2] * w1[1:2, :]
         + x[:, 2:3] * w1[2:3, :]
         + b1_ref[...])
    h = jnp.maximum(h, 0.0)

    # Second layer on the MXU. w2_ref may be bf16 (cast done once in the
    # wrapper); accumulate in f32 and add the f32 bias.
    out = jnp.dot(h.astype(w2_ref.dtype), w2_ref[...],
                  preferred_element_type=jnp.float32) + b2_ref[...]
    o_ref[...] = out.astype(o_ref.dtype)


def decoder_forward(x, w1, b1, w2, b2, *, max_block_b=DEFAULT_TB, gemm_bf16=True):
    B = x.shape[0]
    tb, b_pad, n_steps = _choose_tiling(B, max_block_b)

    xp = x if b_pad == B else jnp.pad(x, ((0, b_pad - B), (0, 0)))
    w2c = w2.astype(jnp.bfloat16) if gemm_bf16 else w2

    cost = pl.CostEstimate(
        flops=2 * b_pad * (IN_DIM * HID_DIM + HID_DIM * OUT_DIM),
        transcendentals=0,
        bytes_accessed=(b_pad * (IN_DIM + OUT_DIM) * 4
                        + IN_DIM * HID_DIM * 4 + HID_DIM * 4
                        + HID_DIM * OUT_DIM * w2c.dtype.itemsize + OUT_DIM * 4),
    )

    out = pl.pallas_call(
        decoder_kernel,
        out_shape=jax.ShapeDtypeStruct((b_pad, OUT_DIM), jnp.float32),
        grid_spec=pl.GridSpec(
            grid=(n_steps,),
            in_specs=[
                # x streams per batch tile.
                pl.BlockSpec((tb, IN_DIM), lambda i: (i, 0)),
                # Weights / biases stay resident across the whole grid.
                pl.BlockSpec((IN_DIM, HID_DIM), lambda i: (0, 0)),
                pl.BlockSpec((1, HID_DIM), lambda i: (0, 0)),
                pl.BlockSpec((HID_DIM, OUT_DIM), lambda i: (0, 0)),
                pl.BlockSpec((1, OUT_DIM), lambda i: (0, 0)),
            ],
            out_specs=pl.BlockSpec((tb, OUT_DIM), lambda i: (i, 0)),
        ),
        compiler_params=pltpu.CompilerParams(
            # Batch tiles are independent -> shard across TCs on v7x.
            dimension_semantics=("parallel",),
            vmem_limit_bytes=_vmem_limit_bytes(tb, w2c.dtype.itemsize),
        ),
        cost_estimate=cost,
    )(xp, w1, b1, w2c, b2)

    # Strip (small) batch padding only; output width is already exactly 784.
    return out if b_pad == B else out[:B]


def init_params(key):
    # Deterministic init mimicking PyTorch nn.Linear default:
    # uniform(-1/sqrt(fan_in), +1/sqrt(fan_in)) for both weight and bias.
    k1, k2, k3, k4 = jax.random.split(key, 4)
    bound1 = 1.0 / jnp.sqrt(IN_DIM)
    w1 = jax.random.uniform(k1, (IN_DIM, HID_DIM), jnp.float32, -bound1, bound1)
    b1 = jax.random.uniform(k2, (1, HID_DIM), jnp.float32, -bound1, bound1)
    bound2 = 1.0 / jnp.sqrt(HID_DIM)
    w2 = jax.random.uniform(k3, (HID_DIM, OUT_DIM), jnp.float32, -bound2, bound2)
    b2 = jax.random.uniform(k4, (1, OUT_DIM), jnp.float32, -bound2, bound2)
    return w1, b1, w2, b2


if __name__ == "__main__":
    key = jax.random.PRNGKey(0)
    k_params, k_x1, k_x2 = jax.random.split(key, 3)

    w1, b1, w2, b2 = init_params(k_params)

    # bf16 GEMM inputs (f32 accumulation) -> ~1e-3 relative drift vs f32 ref.
    TOL = dict(atol=2e-2, rtol=2e-2)

    # Case 1: tiny batch, single grid step.
    B1 = 8
    x1 = jax.random.normal(k_x1, (B1, IN_DIM), dtype=jnp.float32)
    out1 = jax.block_until_ready(decoder_forward(x1, w1, b1, w2, b2))
    ref1 = jnp.maximum(x1 @ w1 + b1, 0.0) @ w2 + b2
    assert out1.shape == (B1, OUT_DIM)
    assert jnp.allclose(out1, ref1, **TOL)

    # Case 2: batch that exercises the multi-tile (2-step) grid + row padding.
    B2 = 40
    x2 = jax.random.normal(k_x2, (B2, IN_DIM), dtype=jnp.float32)
    out2 = jax.block_until_ready(decoder_forward(x2, w1, b1, w2, b2))
    ref2 = jnp.maximum(x2 @ w1 + b1, 0.0) @ w2 + b2
    assert out2.shape == (B2, OUT_DIM)
    assert jnp.allclose(out2, ref2, **TOL)

    print("KERNEL_OK")
</pallas_src>

<mosaic_0001>
module attributes {stable_mosaic.version = 11 : i64} {
  func.func @decoder_kernel(%arg0: i32, %arg1: memref<8x3xf32, #tpu.memory_space<vmem>>, %arg2: memref<3x64xf32, #tpu.memory_space<vmem>>, %arg3: memref<1x64xf32, #tpu.memory_space<vmem>>, %arg4: memref<64x784xbf16, #tpu.memory_space<vmem>>, %arg5: memref<1x784xf32, #tpu.memory_space<vmem>>, %arg6: memref<8x784xf32, #tpu.memory_space<vmem>>) attributes {dimension_semantics = [#tpu.dimension_semantics<parallel>], iteration_bounds = array<i64: 1>, scalar_prefetch = 0 : i64, scratch_operands = 0 : i64, tpu.core_type = #tpu.core_type<tc>, window_params = [{transform_indices = @transform_0, window_bounds = array<i64: 8, 3>}, {pipeline_mode = #tpu.pipeline_mode<synchronous>, transform_indices = @transform_1, window_bounds = array<i64: 3, 64>}, {pipeline_mode = #tpu.pipeline_mode<synchronous>, transform_indices = @transform_2, window_bounds = array<i64: 1, 64>}, {pipeline_mode = #tpu.pipeline_mode<synchronous>, transform_indices = @transform_3, window_bounds = array<i64: 64, 784>}, {pipeline_mode = #tpu.pipeline_mode<synchronous>, transform_indices = @transform_4, window_bounds = array<i64: 1, 784>}, {transform_indices = @transform_5, window_bounds = array<i64: 8, 784>}]} {
    %c0 = arith.constant 0 : index
    %c0_0 = arith.constant 0 : index
    %0 = vector.load %arg1[%c0, %c0_0] : memref<8x3xf32, #tpu.memory_space<vmem>>, vector<8x3xf32>
    %c0_1 = arith.constant 0 : index
    %c0_2 = arith.constant 0 : index
    %1 = vector.load %arg2[%c0_1, %c0_2] : memref<3x64xf32, #tpu.memory_space<vmem>>, vector<3x64xf32>
    %2 = vector.extract_strided_slice %0 {offsets = [0, 0], sizes = [8, 1], strides = [1, 1]} : vector<8x3xf32> to vector<8x1xf32>
    %3 = vector.extract_strided_slice %1 {offsets = [0, 0], sizes = [1, 64], strides = [1, 1]} : vector<3x64xf32> to vector<1x64xf32>
    %4 = vector.broadcast %2 : vector<8x1xf32> to vector<8x64xf32>
    %5 = vector.broadcast %3 : vector<1x64xf32> to vector<8x64xf32>
    %6 = arith.mulf %4, %5 : vector<8x64xf32>
    %7 = vector.extract_strided_slice %0 {offsets = [0, 1], sizes = [8, 1], strides = [1, 1]} : vector<8x3xf32> to vector<8x1xf32>
    %8 = vector.extract_strided_slice %1 {offsets = [1, 0], sizes = [1, 64], strides = [1, 1]} : vector<3x64xf32> to vector<1x64xf32>
    %9 = vector.broadcast %7 : vector<8x1xf32> to vector<8x64xf32>
    %10 = vector.broadcast %8 : vector<1x64xf32> to vector<8x64xf32>
    %11 = arith.mulf %9, %10 : vector<8x64xf32>
    %12 = arith.addf %6, %11 : vector<8x64xf32>
    %13 = vector.extract_strided_slice %0 {offsets = [0, 2], sizes = [8, 1], strides = [1, 1]} : vector<8x3xf32> to vector<8x1xf32>
    %14 = vector.extract_strided_slice %1 {offsets = [2, 0], sizes = [1, 64], strides = [1, 1]} : vector<3x64xf32> to vector<1x64xf32>
    %15 = vector.broadcast %13 : vector<8x1xf32> to vector<8x64xf32>
    %16 = vector.broadcast %14 : vector<1x64xf32> to vector<8x64xf32>
    %17 = arith.mulf %15, %16 : vector<8x64xf32>
    %18 = arith.addf %12, %17 : vector<8x64xf32>
    %c0_3 = arith.constant 0 : index
    %c0_4 = arith.constant 0 : index
    %19 = vector.load %arg3[%c0_3, %c0_4] : memref<1x64xf32, #tpu.memory_space<vmem>>, vector<1x64xf32>
    %20 = vector.broadcast %19 : vector<1x64xf32> to vector<8x64xf32>
    %21 = arith.addf %18, %20 : vector<8x64xf32>
    %cst = arith.constant 0.000000e+00 : f32
    %22 = vector.broadcast %cst : f32 to vector<8x64xf32>
    %23 = arith.maximumf %21, %22 : vector<8x64xf32>
    %24 = arith.truncf %23 : vector<8x64xf32> to vector<8x64xbf16>
    %c0_5 = arith.constant 0 : index
    %c0_6 = arith.constant 0 : index
    %25 = vector.load %arg4[%c0_5, %c0_6] : memref<64x784xbf16, #tpu.memory_space<vmem>>, vector<64x784xbf16>
    %cst_7 = arith.constant dense<0.000000e+00> : vector<8x784xf32>
    %26 = tpu.matmul %24, %25, %cst_7 {dimension_numbers = #tpu.dot_dimension_numbers<[1], [0], [0], [1], [0, 0, 1, 1], [], []>} : vector<8x64xbf16>, vector<64x784xbf16>, vector<8x784xf32> -> vector<8x784xf32>
    %c0_8 = arith.constant 0 : index
    %c0_9 = arith.constant 0 : index
    %27 = vector.load %arg5[%c0_8, %c0_9] : memref<1x784xf32, #tpu.memory_space<vmem>>, vector<1x784xf32>
    %28 = vector.broadcast %27 : vector<1x784xf32> to vector<8x784xf32>
    %29 = arith.addf %26, %28 : vector<8x784xf32>
    %c0_10 = arith.constant 0 : index
    %c0_11 = arith.constant 0 : index
    %30 = vector.load %arg6[%c0_10, %c0_11] : memref<8x784xf32, #tpu.memory_space<vmem>>, vector<8x784xf32>
    tpu.vector_store %arg6[%c0_10, %c0_11], %29 {strides = array<i32>} : memref<8x784xf32, #tpu.memory_space<vmem>>, vector<8x784xf32>,
    return
  }
  func.func @transform_0(%arg0: i32) -> (i32, i32) {
    %c0_i32 = arith.constant 0 : i32
    %c0_i32_0 = arith.constant 0 : i32
    return %arg0, %c0_i32 : i32, i32
  }
  func.func @transform_1(%arg0: i32) -> (i32, i32) {
    %c0_i32 = arith.constant 0 : i32
    %c0_i32_0 = arith.constant 0 : i32
    %c0_i32_1 = arith.constant 0 : i32
    return %c0_i32, %c0_i32_0 : i32, i32
  }
  func.func @transform_2(%arg0: i32) -> (i32, i32) {
    %c0_i32 = arith.constant 0 : i32
    %c0_i32_0 = arith.constant 0 : i32
    %c0_i32_1 = arith.constant 0 : i32
    return %c0_i32, %c0_i32_0 : i32, i32
  }
  func.func @transform_3(%arg0: i32) -> (i32, i32) {
    %c0_i32 = arith.constant 0 : i32
    %c0_i32_0 = arith.constant 0 : i32
    %c0_i32_1 = arith.constant 0 : i32
    return %c0_i32, %c0_i32_0 : i32, i32
  }
  func.func @transform_4(%arg0: i32) -> (i32, i32) {
    %c0_i32 = arith.constant 0 : i32
    %c0_i32_0 = arith.constant 0 : i32
    %c0_i32_1 = arith.constant 0 : i32
    return %c0_i32, %c0_i32_0 : i32, i32
  }
  func.func @transform_5(%arg0: i32) -> (i32, i32) {
    %c0_i32 = arith.constant 0 : i32
    %c0_i32_0 = arith.constant 0 : i32
    return %arg0, %c0_i32 : i32, i32
  }
}

</mosaic_0001>

<bundles_post_ra>
// kernel: tpu_custom_call.1
= control target key start
LH: loop header
LB: loop body
LE: loop exit
PB: predicated region body
PF: predicated region fallthrough
CT: control target
= control target key end

     0   :  { %10 = vsyncpa [#allocation3], 0  ;;  %s646_s0 = inlined_call_operand.vmem [shape: f32[8,3], index: 0, kind: input, shape index: {}]   ;;  %s647_s1 = inlined_call_operand.vmem [shape: f32[3,64], index: 1, kind: input, shape index: {}]   ;;  %s648_s2 = inlined_call_operand.vmem [shape: f32[1,64], index: 2, kind: input, shape index: {}]   ;;  %s649_s3 = inlined_call_operand.hbm [shape: bf16[64,784], index: 3, kind: input, shape index: {}]   ;;  %s650_s4 = inlined_call_operand.vmem [shape: f32[1,784], index: 4, kind: input, shape index: {}]   ;;  %s651_s5 = inlined_call_operand.hbm [shape: f32[8,784], index: 5, kind: output, shape index: {}]  }
   0x1   :  { %11 = vsyncpa [#allocation4], 0  ;;  %s22_s20 = sshll.u32 %s649_s3, 4  ;;  %s591_s21 = smov [#allocation2]   ;;  %s23_s20 = int_to_ptr.hbm [resolvable:$true] %s22_s20 }
   0x2   :  { %s24_s22 = sshll.u32 %s591_s21, 4  ;;  %s592_s23 = smov 448   ;;  %s25_s22 = int_to_ptr.vmem [resolvable:$true] %s24_s22 }
   0x3   :  { %s593_s24 = smov 28  }
   0x4   :  { %30 = dma.hbm_to_vmem [thread:$0]  %s23_s20, 3584, %s25_s22, [#allocation3], %s592_s23, %s592_s23, %s593_s24  }
   0x5   :  { %587 = dma.done.wait [#allocation3], 3584  }
   0x6   :  { %588 = vsyncadd [#allocation3], 4294963712  ;;  %v594_v0 = vmov 0   ;;  %v595_v1 = vmov 2   ;;  %v38_v2 = vld [vmem:[%s646_s0] sm:$0xff]  ;;  %v596_v3 = vmov 1  }
   0x7   :  { %534 = vset.pattern.permute.xlu0 %v594_v0  ;;  %536 = vset.pattern.permute.xlu1 %v595_v1  ;;  %v466_v4 = vld [vmem:[#allocation2 + $0xa8] sm:$0xf]  ;;  %v523_v5 = vld [vmem:[#allocation2 + $0xc0] sm:$0xf0]  ;;  %v520_v6 = vld [vmem:[#allocation2 + $0xac] sm:$0xf] }
   0x8   :  { %42 = vperm.xlu0 %534, %v38_v2   ;;  %55 = vperm.xlu1 %536, %v38_v2   ;;  %v467_v7 = vor.u32 %v523_v5, %v466_v4  ;;  %v468_v8 = vld [vmem:[#allocation2 + $0xc4] sm:$0xf0]  ;;  %v474_v9 = vld [vmem:[#allocation2 + $0xb0] sm:$0xf]  ;;  %v524_v10 = vld [vmem:[#allocation2 + $0xc8] sm:$0xf0] }
   0x9   :  { %v471_v11 = vor.u32 %v520_v6, %v468_v8  ;;  %v475_v12 = vor.u32 %v524_v10, %v474_v9  ;;  %v521_v13 = vld [vmem:[#allocation2 + $0xb4] sm:$0xf]  ;;  %v476_v14 = vld [vmem:[#allocation2 + $0xcc] sm:$0xf0]  ;;  %v516_v17 = vld [vmem:[#allocation2 + $0x88] sm:$0xf0] }
   0xa   :  { %268 = vmatpush.bf16.msra.mxu0 %v467_v7  ;;  %v479_v15 = vor.u32 %v521_v13, %v476_v14  ;;  %v438_v16 = vld [vmem:[#allocation2 + $0x70] sm:$0xf]  ;;  %v513_v18 = vld [vmem:[#allocation2 + $0x74] sm:$0xf]  ;;  %v446_v21 = vld [vmem:[#allocation2 + $0x78] sm:$0xf] }
   0xb   :  { %281 = vmatpush.bf16.msra.mxu1 %v471_v11  ;;  %294 = vmatpush.bf16.msra.mxu2 %v475_v12  ;;  %v439_v19 = vor.u32 %v516_v17, %v438_v16  ;;  %v440_v20 = vld [vmem:[#allocation2 + $0x8c] sm:$0xf0]  ;;  %v517_v22 = vld [vmem:[#allocation2 + $0x90] sm:$0xf0]  ;;  %v514_v25 = vld [vmem:[#allocation2 + $0x7c] sm:$0xf] }
   0xc   :  { %307 = vmatpush.bf16.msra.mxu3 %v479_v15  ;;  %v443_v23 = vor.u32 %v513_v18, %v440_v20  ;;  %v447_v24 = vor.u32 %v517_v22, %v446_v21  ;;  %v448_v26 = vld [vmem:[#allocation2 + $0x94] sm:$0xf0]  ;;  %v509_v29 = vld [vmem:[#allocation2 + $0x50] sm:$0xf0]  ;;  %v506_v31 = vld [vmem:[#allocation2 + $0x3c] sm:$0xf] }
   0xd   :  { %v451_v27 = vor.u32 %v514_v25, %v448_v26  ;;  %v410_v28 = vld [vmem:[#allocation2 + $0x38] sm:$0xf]  ;;  %v418_v33 = vld [vmem:[#allocation2 + $0x40] sm:$0xf]  ;;  %v510_v35 = vld [vmem:[#allocation2 + $0x58] sm:$0xf0] }
   0xe   :  { %269 = vmatpush.bf16.msra.mxu0 %v439_v19  ;;  %v411_v30 = vor.u32 %v509_v29, %v410_v28  ;;  %v412_v32 = vld [vmem:[#allocation2 + $0x54] sm:$0xf0]  ;;  %v507_v36 = vld [vmem:[#allocation2 + $0x44] sm:$0xf]  ;;  %v420_v37 = vld [vmem:[#allocation2 + $0x5c] sm:$0xf0]  ;;  %v419_v38 = vor.u32 %v510_v35, %v418_v33 }
   0xf   :  { %282 = vmatpush.bf16.msra.mxu1 %v443_v23  ;;  %295 = vmatpush.bf16.msra.mxu2 %v447_v24  ;;  %v415_v34 = vor.u32 %v506_v31, %v412_v32  ;;  %v423_v39 = vor.u32 %v507_v36, %v420_v37  ;;  %v382_v40 = vld [vmem:[#allocation2] sm:$0xf]  ;;  %v502_v41 = vld [vmem:[#allocation2 + $0x18] sm:$0xf0]  ;;  %v499_v42 = vld [vmem:[#allocation2 + $0x4] sm:$0xf] }
  0x10   :  { %535 = vset.pattern.permute.xlu0 %v596_v3  ;;  %308 = vmatpush.bf16.msra.mxu3 %v451_v27  ;;  %v383_v43 = vor.u32 %v502_v41, %v382_v40  ;;  %v384_v44 = vld [vmem:[#allocation2 + $0x1c] sm:$0xf0]  ;;  %v390_v45 = vld [vmem:[#allocation2 + $0x8] sm:$0xf]  ;;  %v503_v46 = vld [vmem:[#allocation2 + $0x20] sm:$0xf0] }
  0x11   :  { %48 = vperm.xlu0 %535, %v38_v2   ;;  %v387_v47 = vor.u32 %v499_v42, %v384_v44  ;;  %v391_v48 = vor.u32 %v503_v46, %v390_v45  ;;  %v500_v49 = vld [vmem:[#allocation2 + $0xc] sm:$0xf]  ;;  %v392_v50 = vld [vmem:[#allocation2 + $0x24] sm:$0xf0]  ;;  %v490_v52 = vld [vmem:[#allocation2 + $0xc0] sm:$0xf] }
  0x12   :  { %270 = vmatpush.bf16.msra.mxu0 %v411_v30  ;;  %v395_v51 = vor.u32 %v500_v49, %v392_v50  ;;  %v526_v53 = vld [vmem:[#allocation2 + $0xd8] sm:$0xf0]  ;;  %v482_v54 = vld [vmem:[#allocation2 + $0xb8] sm:$0xf]  ;;  %v525_v56 = vld [vmem:[#allocation2 + $0xd0] sm:$0xf0] }
  0x13   :  { %283 = vmatpush.bf16.msra.mxu1 %v415_v34  ;;  %296 = vmatpush.bf16.msra.mxu2 %v419_v38  ;;  %v491_v55 = vor.u32 %v526_v53, %v490_v52  ;;  %v522_v57 = vld [vmem:[#allocation2 + $0xbc] sm:$0xf]  ;;  %v484_v58 = vld [vmem:[#allocation2 + $0xd4] sm:$0xf0]  ;;  %v483_v59 = vor.u32 %v525_v56, %v482_v54  ;;  %v462_v61 = vld [vmem:[#allocation2 + $0x88] sm:$0xf] }
  0x14   :  { %309 = vmatpush.bf16.msra.mxu3 %v423_v39  ;;  %v487_v60 = vor.u32 %v522_v57, %v484_v58  ;;  %v519_v62 = vld [vmem:[#allocation2 + $0xa0] sm:$0xf0]  ;;  %v454_v63 = vld [vmem:[#allocation2 + $0x80] sm:$0xf]  ;;  %v434_v6 = vld [vmem:[#allocation2 + $0x50] sm:$0xf] }
  0x15   :  { %v463_v0 = vor.u32 %v519_v62, %v462_v61  ;;  %v515_v2 = vld [vmem:[#allocation2 + $0x84] sm:$0xf]  ;;  %v456_v3 = vld [vmem:[#allocation2 + $0x9c] sm:$0xf0]  ;;  %v512_v7 = vld [vmem:[#allocation2 + $0x68] sm:$0xf0] }
  0x16   :  { %271 = vmatpush.bf16.msra.mxu0 %v383_v43  ;;  %v459_v5 = vor.u32 %v515_v2, %v456_v3  ;;  %v426_v8 = vld [vmem:[#allocation2 + $0x48] sm:$0xf]  ;;  %v511_v9 = vld [vmem:[#allocation2 + $0x60] sm:$0xf0]  ;;  %v508_v10 = vld [vmem:[#allocation2 + $0x4c] sm:$0xf]  ;;  %v435_v12 = vor.u32 %v512_v7, %v434_v6 }
  0x17   :  { %284 = vmatpush.bf16.msra.mxu1 %v387_v47  ;;  %297 = vmatpush.bf16.msra.mxu2 %v391_v48  ;;  %v428_v11 = vld [vmem:[#allocation2 + $0x64] sm:$0xf0]  ;;  %v427_v13 = vor.u32 %v511_v9, %v426_v8  ;;  %v406_v15 = vld [vmem:[#allocation2 + $0x18] sm:$0xf]  ;;  %v505_v16 = vld [vmem:[#allocation2 + $0x30] sm:$0xf0] }
  0x18   :  { %310 = vmatpush.bf16.msra.mxu3 %v395_v51  ;;  %v431_v14 = vor.u32 %v508_v10, %v428_v11  ;;  %v398_v17 = vld [vmem:[#allocation2 + $0x10] sm:$0xf]  ;;  %v504_v18 = vld [vmem:[#allocation2 + $0x28] sm:$0xf0]  ;;  %v501_v19 = vld [vmem:[#allocation2 + $0x14] sm:$0xf]  ;;  %v407_v22 = vor.u32 %v505_v16, %v406_v15 }
  0x19   :  { %537 = vset.pattern.permute.xlu0 %v595_v1  ;;  %v518_v1 = vld [vmem:[#allocation2 + $0x98] sm:$0xf0]  ;;  %v400_v20 = vld [vmem:[#allocation2 + $0x2c] sm:$0xf0]  ;;  %v399_v23 = vor.u32 %v504_v18, %v398_v17  ;;  %v39_v25 = vld [vmem:[%s647_s1] sm:$0x7] }
  0x1a   :  { %320 = vmatpush.bf16.msrb.mxu0 %v483_v59  ;;  %v455_v4 = vor.u32 %v518_v1, %v454_v63  ;;  %v403_v24 = vor.u32 %v501_v19, %v400_v20  ;;  %v45_v26 = vperm.slane %v39_v25, 0  ;;  %v51_v27 = vperm.slane %v39_v25, 1  ;;  %v538_v35 = vld [vmem:[%s648_s2] ss:$0 sm:$0xff]  ;;  %s597_s2 = smov [#allocation5]   ;;  %s370_s7 = sshll.u32 %s651_s5, 4  ;;  %s371_s7 = int_to_ptr.hbm [resolvable:$true] %s370_s7 }
  0x1b   :  { %346 = vmatpush.bf16.msrb.mxu2 %v491_v55  ;;  %333 = vmatpush.bf16.msrb.mxu1 %v487_v60  ;;  %v58_v28 = vperm.slane %v39_v25, 2  ;;  %vm260_vm0 = vcmask 523264   ;;  %v100_v40 = vld [vmem:[%s650_s4] sm:$0x7f]  ;;  %s368_s4 = sshll.u32 %s597_s2, 4  ;;  %vm361_vm1 = vcmask 130048   ;;  %s369_s4 = int_to_ptr.vmem [resolvable:$true] %s368_s4 }
  0x1c   :  { %v102_v41 = vperm.slane %v100_v40, 0  ;;  %v103_v42 = vperm.slane %v100_v40, 1  ;;  %v104_v47 = vperm.slane %v100_v40, 2  ;;  %v105_v48 = vperm.slane %v100_v40, 3 }
  0x1d   :  { %v106_v55 = vperm.slane %v100_v40, 4  ;;  %v107_v56 = vperm.slane %v100_v40, 5  ;;  %v108_v63 = vperm.slane %v100_v40, 6 }
  0x1e   :  { %321 = vmatpush.bf16.msrb.mxu0 %v455_v4 }
  0x1f   :  { %347 = vmatpush.bf16.msrb.mxu2 %v463_v0  ;;  %334 = vmatpush.bf16.msrb.mxu1 %v459_v5 }
  0x22   :  { %322 = vmatpush.bf16.msrb.mxu0 %v427_v13 }
  0x23   :  { %348 = vmatpush.bf16.msrb.mxu2 %v435_v12  ;;  %335 = vmatpush.bf16.msrb.mxu1 %v431_v14 }
  0x26   :  { %323 = vmatpush.bf16.msrb.mxu0 %v399_v23 }
  0x27   :  { %349 = vmatpush.bf16.msrb.mxu2 %v407_v22  ;;  %336 = vmatpush.bf16.msrb.mxu1 %v403_v24 }
  0x7a   :  { %v43_v21 = vpop.permute.xlu0 %42  ;;  %v56_v29 = vpop.permute.xlu1 %55 }
  0x7b   :  { %v46_v31 = vmul.f32 %v45_v26, %v43_v21  ;;  %v59_v33 = vmul.f32 %v58_v28, %v56_v29 }
  0x83   :  { %v49_v30 = vpop.permute.xlu0 %48 }
  0x84   :  { %v52_v32 = vmul.f32 %v51_v27, %v49_v30 }
  0x86   :  { %v53_v34 = vadd.f32 %v52_v32, %v46_v31 }
  0x88   :  { %v60_v36 = vadd.f32 %v59_v33, %v53_v34 }
  0x8a   :  { %v65_v37 = vadd.f32 %v538_v35, %v60_v36 }
  0x8c   :  { %v66_v38 = vmax.f32 %v65_v37, 0.0 }
  0x8e   :  { %v67_v39 = vpack.c.bf16 %v66_v38, %v66_v38 }
  0x90   :  { %492 = vmatmul.msk.bf16.vlgmr.msra.gmra.mxu0 %vm260_vm0, %v67_v39  ;;  %493 = vmatmul.msk.bf16.vlgmr.msra.gmra.mxu1 %vm260_vm0, %v67_v39 }
  0x91   :  { %494 = vmatmul.msk.bf16.vlgmr.msra.gmra.mxu2 %vm260_vm0, %v67_v39  ;;  %495 = vmatmul.msk.bf16.vlgmr.msra.gmra.mxu3 %vm260_vm0, %v67_v39 }
  0xa0   :  { %496 = vmatmul.msk.bf16.vlgmr.msrb.gmra.mxu0 %vm260_vm0, %v67_v39  ;;  %497 = vmatmul.msk.bf16.vlgmr.msrb.gmra.mxu1 %vm260_vm0, %v67_v39 }
  0xa1   :  { %498 = vmatmul.msk.bf16.vlgmr.msrb.gmra.mxu2 %vm260_vm0, %v67_v39 }
 0x10d   :  { %v273_v43 = vpop.f32.mrf.mxu0  ;;  %v286_v44 = vpop.f32.mrf.mxu1 }
 0x10e   :  { %v274_v45 = vadd.f32 %v273_v43, %v102_v41  ;;  %v287_v46 = vadd.f32 %v286_v44, %v103_v42 }
 0x110   :  { %355 = vst [vmem:[#allocation5] sm:$0xff] %v274_v45 }
 0x111   :  { %356 = vst [vmem:[#allocation5 + $0x8] sm:$0xff] %v287_v46 }
 0x114   :  { %v299_v49 = vpop.f32.mrf.mxu2  ;;  %v312_v50 = vpop.f32.mrf.mxu3 }
 0x115   :  { %v300_v51 = vadd.f32 %v299_v49, %v104_v47  ;;  %v313_v52 = vadd.f32 %v312_v50, %v105_v48  ;;  %v275_v53 = vpop.f32.mrf.mxu0  ;;  %v288_v54 = vpop.f32.mrf.mxu1 }
 0x117   :  { %357 = vst [vmem:[#allocation5 + $0x10] sm:$0xff] %v300_v51 }
 0x118   :  { %358 = vst [vmem:[#allocation5 + $0x18] sm:$0xff] %v313_v52 }
 0x11c   :  { %v301_v57 = vpop.f32.mrf.mxu2  ;;  %v314_v58 = vpop.f32.mrf.mxu3 }
 0x11d   :  { %v325_v59 = vpop.f32.mrf.mxu0  ;;  %v338_v60 = vpop.f32.mrf.mxu1 }
 0x11e   :  { %v326_v61 = vadd.f32 %v325_v59, %v106_v55  ;;  %v339_v62 = vadd.f32 %v338_v60, %v107_v56 }
 0x120   :  { %359 = vst [vmem:[#allocation5 + $0x20] sm:$0xff] %v326_v61 }
 0x121   :  { %360 = vst [vmem:[#allocation5 + $0x28] sm:$0xff] %v339_v62 }
 0x124   :  { %v351_v0 = vpop.f32.mrf.mxu2 }
 0x125   :  { %v352_v1 = vadd.f32 %v351_v0, %v108_v63  ;;  %v327_v2 = vpop.f32.mrf.mxu0  ;;  %v340_v3 = vpop.f32.mrf.mxu1 }
 0x127   :  { %362 = vst.msk [vmem:[#allocation5 + $0x30] sm:$0xff] %vm361_vm1, %v352_v1 }
 0x128   :  { %373 = dma.vmem_to_hbm [thread:$0]  %s369_s4, 896, %s371_s7, [#allocation4]  }
 0x12c   :  { %v353_v4 = vpop.f32.mrf.mxu2 }
 0x12d   :  { %589 = dma.done.wait [#allocation4], 896  }
 0x12e   :  { %590 = vsyncadd [#allocation4], 4294966400 }
 0x12f   :  { %378 = vsyncpa [#allocation3], 1 }
 0x130   :  { %379 = vsyncpa [#allocation4], 1 }

</bundles_post_ra>
